<compile_context>
chip_gen: v5e
topology: v5e:2x2
jax: 0.10.0
libtpu: 0.0.40
codegen_flags: <defaults>
</compile_context>

<pallas_src>
import functools

import jax
import jax.numpy as jnp
from jax.experimental import pallas as pl
from jax.experimental.pallas import tpu as pltpu


def _nnmf_kernel(inp_ref, wx_ref, bx_ref, ws_ref, bs_ref, fcw_ref, fcb_ref,
                 out_ref, *, d, dprime, x_layers, s_layers):
    """Feature-major NNMF forward for one batch tile.

    inp_ref: (width_in, block_b) f32, rows = [U|V|Up1|Up2|Vp1|Vp2|target].
    wx/ws:   (layers, n, n) bf16  (y_col = W @ x_col + b_col form).
    bx/bs:   (layers, n, 1) f32.
    fcw:     (2, n) bf16 = [fc1_w ; fc2_w],  fcb: (2, 1) f32.
    out_ref: (2, block_b) f32, row 0 = x_out, row 1 = s_out.
    """
    n = 2 * d + dprime
    zero = jnp.float32(0.0)
    bf16 = jnp.bfloat16

    # --- static sublane slices of the coalesced feature-major input ----------
    uv = inp_ref[0:2 * d, :]                        # U[pixel] ; V[frame]
    o = 2 * d
    up1 = inp_ref[o:o + dprime, :]; o += dprime     # Uprime_1[pixel]
    up2 = inp_ref[o:o + dprime, :]; o += dprime     # Uprime_2[pixel]
    vp1 = inp_ref[o:o + dprime, :]; o += dprime     # Vprime_1[frame]
    vp2 = inp_ref[o:o + dprime, :]; o += dprime     # Vprime_2[frame]
    tgt = inp_ref[o:o + n, :]                       # target (n, block_b)

    # dot_prod = relu(Up1)*relu(Vp1) + relu(Up2)*relu(Vp2)   (full-lane VPU)
    dp = (jnp.maximum(up1, zero) * jnp.maximum(vp1, zero)
          + jnp.maximum(up2, zero) * jnp.maximum(vp2, zero))

    # --- mlp_x chain; concat fused into the first layer's matmul -------------
    #   W0 @ concat([uv; dp]) == W0[:, :2d] @ uv + W0[:, 2d:] @ dp
    w0 = wx_ref[0]
    x = (jnp.dot(w0[:, 0:2 * d], uv.astype(bf16),
                 preferred_element_type=jnp.float32)
         + jnp.dot(w0[:, 2 * d:n], dp.astype(bf16),
                   preferred_element_type=jnp.float32)
         + bx_ref[0])
    for i in range(1, x_layers):
        x = (jnp.dot(wx_ref[i], x.astype(bf16),
                     preferred_element_type=jnp.float32)
             + bx_ref[i])

    # x_out = sigmoid(fc1(x))  -> (1, block_b), lane-dense
    x_out = jax.nn.sigmoid(
        jnp.dot(fcw_ref[0:1, :], x.astype(bf16),
                preferred_element_type=jnp.float32)
        + fcb_ref[0:1, :])

    # s_input = target - x_out  (sublane broadcast of the (1, block_b) row)
    s = tgt - x_out
    for i in range(s_layers):
        s = (jnp.dot(ws_ref[i], s.astype(bf16),
                     preferred_element_type=jnp.float32)
             + bs_ref[i])

    # s_out = sigmoid(fc2(s))
    s_out = jax.nn.sigmoid(
        jnp.dot(fcw_ref[1:2, :], s.astype(bf16),
                preferred_element_type=jnp.float32)
        + fcb_ref[1:2, :])

    # Direct row stores (no concatenate relayout).
    out_ref[0:1, :] = x_out
    out_ref[1:2, :] = s_out


def prepare_weights(params):
    """One-time weight/embedding layout prep hoisted out of the per-call path.

    Column form: nn.Linear y = x @ W.T + b  <=>  y_col = W @ x_col + b_col,
    so MLP weights are used directly (no transpose) and cast to bf16 for the
    MXU.  Embedding tables are pre-transposed so the wrapper gathers columns
    straight into the feature-major coalesced stream.
    """
    wx = jnp.stack(params["mlp_x_w"]).astype(jnp.bfloat16)          # (xl, n, n)
    bx = jnp.stack([b[:, None] for b in params["mlp_x_b"]])          # (xl, n, 1)
    ws = jnp.stack(params["mlp_s_w"]).astype(jnp.bfloat16)          # (sl, n, n)
    bs = jnp.stack([b[:, None] for b in params["mlp_s_b"]])          # (sl, n, 1)
    fcw = jnp.concatenate([params["fc1_w"], params["fc2_w"]],
                          axis=0).astype(jnp.bfloat16)               # (2, n)
    fcb = jnp.concatenate([params["fc1_b"], params["fc2_b"]],
                          axis=0)[:, None]                           # (2, 1)
    emb = {
        "Ut": params["U"].T, "Vt": params["V"].T,
        "Up1t": params["Uprime_1"].T, "Up2t": params["Uprime_2"].T,
        "Vp1t": params["Vprime_1"].T, "Vp2t": params["Vprime_2"].T,
    }
    return {"wx": wx, "bx": bx, "ws": ws, "bs": bs,
            "fcw": fcw, "fcb": fcb, "emb": emb}


def _round_up(x, m):
    return ((x + m - 1) // m) * m


def _num_tensorcores():
    """Best-effort TensorCore count (2 on v7x, 1 on v5e/v6e); defaults to 1."""
    try:
        info = pltpu.get_tpu_info()
        for attr in ("num_cores", "core_count", "num_tensorcores",
                     "tensorcore_count"):
            v = getattr(info, attr, None)
            if isinstance(v, int) and v > 0:
                return v
    except Exception:
        pass
    return 1


def _pick_block_b(B, num_tc, cap=4096):
    """Batch-tile (lane) size: largest multiple of 128 up to `cap`, with a
    >=2-block split only when >=2 TensorCores are available."""
    b_full = _round_up(B, 128)
    bb = min(cap, b_full)
    if num_tc >= 2 and bb == b_full and b_full >= 256:
        bb = _round_up(b_full // num_tc, 128)
    return max(bb, 128)


def _vmem_limit_bytes(width_in, n, x_layers, s_layers, block_b):
    """Explicit scoped-VMEM budget derived from actual buffer sizes (clamped
    to stay inside v7x's 64 MiB physical VMEM)."""
    inp = width_in * block_b * 4 * 2                       # double-buffered input
    out = 2 * block_b * 4 * 2                              # double-buffered output
    wts = (x_layers + s_layers) * (n * n * 2 + n * 4) * 2  # bf16 W + f32 b, x2 buf
    fc = (2 * n * 2 + 2 * 4) * 2
    act = 12 * n * block_b * 4                             # live f32 activations
    est = inp + out + wts + fc + act + (8 << 20)           # + headroom
    return int(min(max(est, 32 << 20), 48 << 20))


@functools.partial(jax.jit, static_argnames=("d", "dprime", "block_b", "b_pad"))
def _nnmf_forward_jit(prepped, pixel, frame, target, *, d, dprime, block_b, b_pad):
    emb = prepped["emb"]
    B = pixel.shape[0]
    n = 2 * d + dprime
    x_layers = prepped["wx"].shape[0]
    s_layers = prepped["ws"].shape[0]

    # Feature-major coalesced stream: one wide DMA per grid step.
    coalesced = jnp.concatenate(
        [emb["Ut"][:, pixel],            # (d, B)
         emb["Vt"][:, frame],            # (d, B)
         emb["Up1t"][:, pixel],          # (dprime, B)
         emb["Up2t"][:, pixel],
         emb["Vp1t"][:, frame],
         emb["Vp2t"][:, frame],
         target.T],                      # (n, B)
        axis=0)                          # (2d + 4*dprime + n, B)
    width_in = coalesced.shape[0]
    if b_pad != B:
        coalesced = jnp.pad(coalesced, ((0, 0), (0, b_pad - B)))

    kernel = functools.partial(_nnmf_kernel, d=d, dprime=dprime,
                               x_layers=x_layers, s_layers=s_layers)

    out = pl.pallas_call(
        kernel,
        out_shape=jax.ShapeDtypeStruct((2, b_pad), jnp.float32),
        grid_spec=pltpu.PrefetchScalarGridSpec(
            num_scalar_prefetch=0,
            grid=(b_pad // block_b,),
            in_specs=[
                pl.BlockSpec((width_in, block_b), lambda i: (0, i)),  # coalesced
                pl.BlockSpec((x_layers, n, n), lambda i: (0, 0, 0)),  # mlp_x W
                pl.BlockSpec((x_layers, n, 1), lambda i: (0, 0, 0)),  # mlp_x b
                pl.BlockSpec((s_layers, n, n), lambda i: (0, 0, 0)),  # mlp_s W
                pl.BlockSpec((s_layers, n, 1), lambda i: (0, 0, 0)),  # mlp_s b
                pl.BlockSpec((2, n), lambda i: (0, 0)),               # [fc1;fc2] W
                pl.BlockSpec((2, 1), lambda i: (0, 0)),               # [fc1;fc2] b
            ],
            out_specs=pl.BlockSpec((2, block_b), lambda i: (0, i)),
        ),
        compiler_params=pltpu.CompilerParams(
            dimension_semantics=("parallel",),
            vmem_limit_bytes=_vmem_limit_bytes(width_in, n, x_layers,
                                               s_layers, block_b)),
    )(coalesced, prepped["wx"], prepped["bx"], prepped["ws"], prepped["bs"],
      prepped["fcw"], prepped["fcb"])

    # Row 0 = x_out, row 1 = s_out; drop lane padding, return (B, 1) columns.
    return out[0, :B][:, None], out[1, :B][:, None]


def nnmf_forward(prepped, pixel, frame, target, *, d, dprime, block_b=None):
    assert d > 0, "this kernel implements the cat=True (d != 0) path"
    # TODO(synk): the d == 0 (cat=False) branch and the 0-layer MLP edge case
    # are not implemented; the kernel covers the cat=True path used in the demo.
    B = pixel.shape[0]
    x_layers = prepped["wx"].shape[0]
    s_layers = prepped["ws"].shape[0]
    assert x_layers >= 1 and s_layers >= 1
    if block_b is None:
        block_b = _pick_block_b(B, _num_tensorcores())
    b_pad = _round_up(B, block_b)
    return _nnmf_forward_jit(prepped, pixel, frame, target,
                             d=d, dprime=dprime, block_b=block_b, b_pad=b_pad)


def nnmf_reference(params, pixel, frame, target, *, d, dprime):
    """Pure-JAX f32 reference mirroring the PyTorch forward."""
    relu = lambda a: jnp.maximum(a, 0.0)
    dp = (relu(params["Uprime_1"][pixel]) * relu(params["Vprime_1"][frame])
          + relu(params["Uprime_2"][pixel]) * relu(params["Vprime_2"][frame]))
    x = jnp.concatenate([params["U"][pixel], params["V"][frame], dp], axis=1)
    for w, b in zip(params["mlp_x_w"], params["mlp_x_b"]):
        x = x @ w.T + b
    x_out = jax.nn.sigmoid(x @ params["fc1_w"].T + params["fc1_b"])
    s = target - x_out
    for w, b in zip(params["mlp_s_w"], params["mlp_s_b"]):
        s = s @ w.T + b
    s_out = jax.nn.sigmoid(s @ params["fc2_w"].T + params["fc2_b"])
    return x_out, s_out


def make_params(key, *, num_pixels, num_frames, d, dprime, n, x_layers, s_layers):
    keys = jax.random.split(key, 16)
    p = {}
    p["U"] = 0.1 * jax.random.normal(keys[0], (num_pixels, d), jnp.float32)
    p["V"] = 0.1 * jax.random.normal(keys[1], (num_frames, d), jnp.float32)
    # Embedding init ~ N(0.5, 0.01) as in init_params (deterministic here).
    p["Uprime_1"] = 0.5 + 0.01 * jax.random.normal(keys[2], (num_pixels, dprime), jnp.float32)
    p["Uprime_2"] = 0.5 + 0.01 * jax.random.normal(keys[3], (num_pixels, dprime), jnp.float32)
    p["Vprime_1"] = 0.5 + 0.01 * jax.random.normal(keys[4], (num_frames, dprime), jnp.float32)
    p["Vprime_2"] = 0.5 + 0.01 * jax.random.normal(keys[5], (num_frames, dprime), jnp.float32)
    scale = 1.0 / jnp.sqrt(n)
    p["mlp_x_w"] = [scale * jax.random.normal(jax.random.fold_in(keys[6], i), (n, n), jnp.float32)
                    for i in range(x_layers)]
    p["mlp_x_b"] = [0.02 * jax.random.normal(jax.random.fold_in(keys[7], i), (n,), jnp.float32)
                    for i in range(x_layers)]
    p["mlp_s_w"] = [scale * jax.random.normal(jax.random.fold_in(keys[8], i), (n, n), jnp.float32)
                    for i in range(s_layers)]
    p["mlp_s_b"] = [0.02 * jax.random.normal(jax.random.fold_in(keys[9], i), (n,), jnp.float32)
                    for i in range(s_layers)]
    p["fc1_w"] = scale * jax.random.normal(keys[10], (1, n), jnp.float32)
    p["fc1_b"] = 0.02 * jax.random.normal(keys[11], (1,), jnp.float32)
    p["fc2_w"] = scale * jax.random.normal(keys[12], (1, n), jnp.float32)
    p["fc2_b"] = 0.02 * jax.random.normal(keys[13], (1,), jnp.float32)
    return p


if __name__ == "__main__":
    # Small, forward-consistent sizes: x_nodes == s_nodes == 2*d + dprime.
    d = 8
    dprime = 16
    n = 2 * d + dprime          # 32 == x_nodes == s_nodes
    x_layers = 2
    s_layers = 2
    num_pixels = 64             # matrix2d.shape[0]
    num_frames = 32             # matrix2d.shape[1]
    B = 128                     # batch of (pixel, frame) pairs

    key = jax.random.PRNGKey(0)
    kp, kpix, kfr, ktg = jax.random.split(key, 4)
    params = make_params(kp, num_pixels=num_pixels, num_frames=num_frames,
                         d=d, dprime=dprime, n=n,
                         x_layers=x_layers, s_layers=s_layers)

    pixel = jax.random.randint(kpix, (B,), 0, num_pixels, dtype=jnp.int32)
    frame = jax.random.randint(kfr, (B,), 0, num_frames, dtype=jnp.int32)
    target = jax.random.uniform(ktg, (B, n), jnp.float32)   # (B, s_nodes)

    prepped = prepare_weights(params)   # one-time weight/embedding layout prep
    x_out, s_out = nnmf_forward(prepped, pixel, frame, target, d=d, dprime=dprime)
    jax.block_until_ready((x_out, s_out))

    x_ref, s_ref = nnmf_reference(params, pixel, frame, target, d=d, dprime=dprime)
    assert x_out.shape == (B, 1) and s_out.shape == (B, 1)
    # bf16 matmul operands (f32 accumulation) => relaxed tolerance vs f32 reference.
    assert jnp.allclose(x_out, x_ref, atol=2e-2, rtol=2e-2)
    assert jnp.allclose(s_out, s_ref, atol=2e-2, rtol=2e-2)

    print("KERNEL_OK")
</pallas_src>

<mosaic_0001>
module attributes {stable_mosaic.version = 11 : i64} {
  func.func @_nnmf_kernel(%arg0: i32, %arg1: memref<112x128xf32, #tpu.memory_space<vmem>>, %arg2: memref<2x32x32xbf16, #tpu.memory_space<vmem>>, %arg3: memref<2x32x1xf32, #tpu.memory_space<vmem>>, %arg4: memref<2x32x32xbf16, #tpu.memory_space<vmem>>, %arg5: memref<2x32x1xf32, #tpu.memory_space<vmem>>, %arg6: memref<2x32xbf16, #tpu.memory_space<vmem>>, %arg7: memref<2x1xf32, #tpu.memory_space<vmem>>, %arg8: memref<2x128xf32, #tpu.memory_space<vmem>>) attributes {dimension_semantics = [#tpu.dimension_semantics<parallel>], iteration_bounds = array<i64: 1>, scalar_prefetch = 0 : i64, scratch_operands = 0 : i64, tpu.core_type = #tpu.core_type<tc>, window_params = [{transform_indices = @transform_0, window_bounds = array<i64: 112, 128>}, {pipeline_mode = #tpu.pipeline_mode<synchronous>, transform_indices = @transform_1, window_bounds = array<i64: 2, 32, 32>}, {pipeline_mode = #tpu.pipeline_mode<synchronous>, transform_indices = @transform_2, window_bounds = array<i64: 2, 32, 1>}, {pipeline_mode = #tpu.pipeline_mode<synchronous>, transform_indices = @transform_3, window_bounds = array<i64: 2, 32, 32>}, {pipeline_mode = #tpu.pipeline_mode<synchronous>, transform_indices = @transform_4, window_bounds = array<i64: 2, 32, 1>}, {pipeline_mode = #tpu.pipeline_mode<synchronous>, transform_indices = @transform_5, window_bounds = array<i64: 2, 32>}, {pipeline_mode = #tpu.pipeline_mode<synchronous>, transform_indices = @transform_6, window_bounds = array<i64: 2, 1>}, {transform_indices = @transform_7, window_bounds = array<i64: 2, 128>}]} {
    %c0 = arith.constant 0 : index
    %c0_0 = arith.constant 0 : index
    %0 = vector.load %arg1[%c0, %c0_0] : memref<112x128xf32, #tpu.memory_space<vmem>>, vector<16x128xf32>
    %c16 = arith.constant 16 : index
    %c0_1 = arith.constant 0 : index
    %1 = vector.load %arg1[%c16, %c0_1] : memref<112x128xf32, #tpu.memory_space<vmem>>, vector<16x128xf32>
    %c32 = arith.constant 32 : index
    %c0_2 = arith.constant 0 : index
    %2 = vector.load %arg1[%c32, %c0_2] : memref<112x128xf32, #tpu.memory_space<vmem>>, vector<16x128xf32>
    %c48 = arith.constant 48 : index
    %c0_3 = arith.constant 0 : index
    %3 = vector.load %arg1[%c48, %c0_3] : memref<112x128xf32, #tpu.memory_space<vmem>>, vector<16x128xf32>
    %c64 = arith.constant 64 : index
    %c0_4 = arith.constant 0 : index
    %4 = vector.load %arg1[%c64, %c0_4] : memref<112x128xf32, #tpu.memory_space<vmem>>, vector<16x128xf32>
    %c80 = arith.constant 80 : index
    %c0_5 = arith.constant 0 : index
    %5 = vector.load %arg1[%c80, %c0_5] : memref<112x128xf32, #tpu.memory_space<vmem>>, vector<32x128xf32>
    %cst = arith.constant 0.000000e+00 : f32
    %6 = vector.broadcast %cst : f32 to vector<16x128xf32>
    %7 = arith.maximumf %1, %6 : vector<16x128xf32>
    %cst_6 = arith.constant 0.000000e+00 : f32
    %8 = vector.broadcast %cst_6 : f32 to vector<16x128xf32>
    %9 = arith.maximumf %3, %8 : vector<16x128xf32>
    %10 = arith.mulf %7, %9 : vector<16x128xf32>
    %cst_7 = arith.constant 0.000000e+00 : f32
    %11 = vector.broadcast %cst_7 : f32 to vector<16x128xf32>
    %12 = arith.maximumf %2, %11 : vector<16x128xf32>
    %cst_8 = arith.constant 0.000000e+00 : f32
    %13 = vector.broadcast %cst_8 : f32 to vector<16x128xf32>
    %14 = arith.maximumf %4, %13 : vector<16x128xf32>
    %15 = arith.mulf %12, %14 : vector<16x128xf32>
    %16 = arith.addf %10, %15 : vector<16x128xf32>
    %c0_9 = arith.constant 0 : index
    %c0_10 = arith.constant 0 : index
    %c0_11 = arith.constant 0 : index
    %17 = vector.load %arg2[%c0_9, %c0_10, %c0_11] : memref<2x32x32xbf16, #tpu.memory_space<vmem>>, vector<1x32x32xbf16>
    %18 = vector.shape_cast %17 : vector<1x32x32xbf16> to vector<32x32xbf16>
    %19 = vector.extract_strided_slice %18 {offsets = [0, 0], sizes = [32, 16], strides = [1, 1]} : vector<32x32xbf16> to vector<32x16xbf16>
    %20 = arith.truncf %0 : vector<16x128xf32> to vector<16x128xbf16>
    %cst_12 = arith.constant dense<0.000000e+00> : vector<32x128xf32>
    %21 = tpu.matmul %19, %20, %cst_12 {dimension_numbers = #tpu.dot_dimension_numbers<[1], [0], [0], [1], [0, 0, 1, 1], [], []>} : vector<32x16xbf16>, vector<16x128xbf16>, vector<32x128xf32> -> vector<32x128xf32>
    %22 = vector.extract_strided_slice %18 {offsets = [0, 16], sizes = [32, 16], strides = [1, 1]} : vector<32x32xbf16> to vector<32x16xbf16>
    %23 = arith.truncf %16 : vector<16x128xf32> to vector<16x128xbf16>
    %cst_13 = arith.constant dense<0.000000e+00> : vector<32x128xf32>
    %24 = tpu.matmul %22, %23, %cst_13 {dimension_numbers = #tpu.dot_dimension_numbers<[1], [0], [0], [1], [0, 0, 1, 1], [], []>} : vector<32x16xbf16>, vector<16x128xbf16>, vector<32x128xf32> -> vector<32x128xf32>
    %25 = arith.addf %21, %24 : vector<32x128xf32>
    %c0_14 = arith.constant 0 : index
    %c0_15 = arith.constant 0 : index
    %c0_16 = arith.constant 0 : index
    %26 = vector.load %arg3[%c0_14, %c0_15, %c0_16] : memref<2x32x1xf32, #tpu.memory_space<vmem>>, vector<1x32x1xf32>
    %27 = vector.shape_cast %26 : vector<1x32x1xf32> to vector<32x1xf32>
    %28 = vector.broadcast %27 : vector<32x1xf32> to vector<32x128xf32>
    %29 = arith.addf %25, %28 : vector<32x128xf32>
    %c1 = arith.constant 1 : index
    %c0_17 = arith.constant 0 : index
    %c0_18 = arith.constant 0 : index
    %30 = vector.load %arg2[%c1, %c0_17, %c0_18] : memref<2x32x32xbf16, #tpu.memory_space<vmem>>, vector<1x32x32xbf16>
    %31 = vector.shape_cast %30 : vector<1x32x32xbf16> to vector<32x32xbf16>
    %32 = arith.truncf %29 : vector<32x128xf32> to vector<32x128xbf16>
    %cst_19 = arith.constant dense<0.000000e+00> : vector<32x128xf32>
    %33 = tpu.matmul %31, %32, %cst_19 {dimension_numbers = #tpu.dot_dimension_numbers<[1], [0], [0], [1], [0, 0, 1, 1], [], []>} : vector<32x32xbf16>, vector<32x128xbf16>, vector<32x128xf32> -> vector<32x128xf32>
    %c1_20 = arith.constant 1 : index
    %c0_21 = arith.constant 0 : index
    %c0_22 = arith.constant 0 : index
    %34 = vector.load %arg3[%c1_20, %c0_21, %c0_22] : memref<2x32x1xf32, #tpu.memory_space<vmem>>, vector<1x32x1xf32>
    %35 = vector.shape_cast %34 : vector<1x32x1xf32> to vector<32x1xf32>
    %36 = vector.broadcast %35 : vector<32x1xf32> to vector<32x128xf32>
    %37 = arith.addf %33, %36 : vector<32x128xf32>
    %c0_23 = arith.constant 0 : index
    %c0_24 = arith.constant 0 : index
    %38 = vector.load %arg6[%c0_23, %c0_24] : memref<2x32xbf16, #tpu.memory_space<vmem>>, vector<1x32xbf16>
    %39 = arith.truncf %37 : vector<32x128xf32> to vector<32x128xbf16>
    %cst_25 = arith.constant dense<0.000000e+00> : vector<1x128xf32>
    %40 = tpu.matmul %38, %39, %cst_25 {dimension_numbers = #tpu.dot_dimension_numbers<[1], [0], [0], [1], [0, 0, 1, 1], [], []>} : vector<1x32xbf16>, vector<32x128xbf16>, vector<1x128xf32> -> vector<1x128xf32>
    %c0_26 = arith.constant 0 : index
    %c0_27 = arith.constant 0 : index
    %41 = vector.load %arg7[%c0_26, %c0_27] : memref<2x1xf32, #tpu.memory_space<vmem>>, vector<1x1xf32>
    %42 = vector.broadcast %41 : vector<1x1xf32> to vector<1x128xf32>
    %43 = arith.addf %40, %42 : vector<1x128xf32>
    %44 = arith.negf %43 : vector<1x128xf32>
    %45 = math.exp %44 : vector<1x128xf32>
    %cst_28 = arith.constant 1.000000e+00 : f32
    %46 = vector.broadcast %cst_28 : f32 to vector<1x128xf32>
    %47 = arith.addf %46, %45 : vector<1x128xf32>
    %48 = arith.divf %46, %47 : vector<1x128xf32>
    %49 = vector.broadcast %48 : vector<1x128xf32> to vector<32x128xf32>
    %50 = arith.subf %5, %49 : vector<32x128xf32>
    %c0_29 = arith.constant 0 : index
    %c0_30 = arith.constant 0 : index
    %c0_31 = arith.constant 0 : index
    %51 = vector.load %arg4[%c0_29, %c0_30, %c0_31] : memref<2x32x32xbf16, #tpu.memory_space<vmem>>, vector<1x32x32xbf16>
    %52 = vector.shape_cast %51 : vector<1x32x32xbf16> to vector<32x32xbf16>
    %53 = arith.truncf %50 : vector<32x128xf32> to vector<32x128xbf16>
    %cst_32 = arith.constant dense<0.000000e+00> : vector<32x128xf32>
    %54 = tpu.matmul %52, %53, %cst_32 {dimension_numbers = #tpu.dot_dimension_numbers<[1], [0], [0], [1], [0, 0, 1, 1], [], []>} : vector<32x32xbf16>, vector<32x128xbf16>, vector<32x128xf32> -> vector<32x128xf32>
    %c0_33 = arith.constant 0 : index
    %c0_34 = arith.constant 0 : index
    %c0_35 = arith.constant 0 : index
    %55 = vector.load %arg5[%c0_33, %c0_34, %c0_35] : memref<2x32x1xf32, #tpu.memory_space<vmem>>, vector<1x32x1xf32>
    %56 = vector.shape_cast %55 : vector<1x32x1xf32> to vector<32x1xf32>
    %57 = vector.broadcast %56 : vector<32x1xf32> to vector<32x128xf32>
    %58 = arith.addf %54, %57 : vector<32x128xf32>
    %c1_36 = arith.constant 1 : index
    %c0_37 = arith.constant 0 : index
    %c0_38 = arith.constant 0 : index
    %59 = vector.load %arg4[%c1_36, %c0_37, %c0_38] : memref<2x32x32xbf16, #tpu.memory_space<vmem>>, vector<1x32x32xbf16>
    %60 = vector.shape_cast %59 : vector<1x32x32xbf16> to vector<32x32xbf16>
    %61 = arith.truncf %58 : vector<32x128xf32> to vector<32x128xbf16>
    %cst_39 = arith.constant dense<0.000000e+00> : vector<32x128xf32>
    %62 = tpu.matmul %60, %61, %cst_39 {dimension_numbers = #tpu.dot_dimension_numbers<[1], [0], [0], [1], [0, 0, 1, 1], [], []>} : vector<32x32xbf16>, vector<32x128xbf16>, vector<32x128xf32> -> vector<32x128xf32>
    %c1_40 = arith.constant 1 : index
    %c0_41 = arith.constant 0 : index
    %c0_42 = arith.constant 0 : index
    %63 = vector.load %arg5[%c1_40, %c0_41, %c0_42] : memref<2x32x1xf32, #tpu.memory_space<vmem>>, vector<1x32x1xf32>
    %64 = vector.shape_cast %63 : vector<1x32x1xf32> to vector<32x1xf32>
    %65 = vector.broadcast %64 : vector<32x1xf32> to vector<32x128xf32>
    %66 = arith.addf %62, %65 : vector<32x128xf32>
    %c1_43 = arith.constant 1 : index
    %c0_44 = arith.constant 0 : index
    %67 = vector.load %arg6[%c1_43, %c0_44] : memref<2x32xbf16, #tpu.memory_space<vmem>>, vector<1x32xbf16>
    %68 = arith.truncf %66 : vector<32x128xf32> to vector<32x128xbf16>
    %cst_45 = arith.constant dense<0.000000e+00> : vector<1x128xf32>
    %69 = tpu.matmul %67, %68, %cst_45 {dimension_numbers = #tpu.dot_dimension_numbers<[1], [0], [0], [1], [0, 0, 1, 1], [], []>} : vector<1x32xbf16>, vector<32x128xbf16>, vector<1x128xf32> -> vector<1x128xf32>
    %c1_46 = arith.constant 1 : index
    %c0_47 = arith.constant 0 : index
    %70 = vector.load %arg7[%c1_46, %c0_47] : memref<2x1xf32, #tpu.memory_space<vmem>>, vector<1x1xf32>
    %71 = vector.broadcast %70 : vector<1x1xf32> to vector<1x128xf32>
    %72 = arith.addf %69, %71 : vector<1x128xf32>
    %73 = arith.negf %72 : vector<1x128xf32>
    %74 = math.exp %73 : vector<1x128xf32>
    %cst_48 = arith.constant 1.000000e+00 : f32
    %75 = vector.broadcast %cst_48 : f32 to vector<1x128xf32>
    %76 = arith.addf %75, %74 : vector<1x128xf32>
    %77 = arith.divf %75, %76 : vector<1x128xf32>
    %c0_49 = arith.constant 0 : index
    %c0_50 = arith.constant 0 : index
    %78 = vector.load %arg8[%c0_49, %c0_50] : memref<2x128xf32, #tpu.memory_space<vmem>>, vector<1x128xf32>
    tpu.vector_store %arg8[%c0_49, %c0_50], %48 {strides = array<i32>} : memref<2x128xf32, #tpu.memory_space<vmem>>, vector<1x128xf32>,
    %c1_51 = arith.constant 1 : index
    %c0_52 = arith.constant 0 : index
    %79 = vector.load %arg8[%c1_51, %c0_52] : memref<2x128xf32, #tpu.memory_space<vmem>>, vector<1x128xf32>
    tpu.vector_store %arg8[%c1_51, %c0_52], %77 {strides = array<i32>} : memref<2x128xf32, #tpu.memory_space<vmem>>, vector<1x128xf32>,
    return
  }
  func.func @transform_0(%arg0: i32) -> (i32, i32) {
    %c0_i32 = arith.constant 0 : i32
    %c0_i32_0 = arith.constant 0 : i32
    return %c0_i32, %arg0 : i32, i32
  }
  func.func @transform_1(%arg0: i32) -> (i32, i32, i32) {
    %c0_i32 = arith.constant 0 : i32
    %c0_i32_0 = arith.constant 0 : i32
    %c0_i32_1 = arith.constant 0 : i32
    %c0_i32_2 = arith.constant 0 : i32
    return %c0_i32, %c0_i32_0, %c0_i32_1 : i32, i32, i32
  }
  func.func @transform_2(%arg0: i32) -> (i32, i32, i32) {
    %c0_i32 = arith.constant 0 : i32
    %c0_i32_0 = arith.constant 0 : i32
    %c0_i32_1 = arith.constant 0 : i32
    %c0_i32_2 = arith.constant 0 : i32
    return %c0_i32, %c0_i32_0, %c0_i32_1 : i32, i32, i32
  }
  func.func @transform_3(%arg0: i32) -> (i32, i32, i32) {
    %c0_i32 = arith.constant 0 : i32
    %c0_i32_0 = arith.constant 0 : i32
    %c0_i32_1 = arith.constant 0 : i32
    %c0_i32_2 = arith.constant 0 : i32
    return %c0_i32, %c0_i32_0, %c0_i32_1 : i32, i32, i32
  }
  func.func @transform_4(%arg0: i32) -> (i32, i32, i32) {
    %c0_i32 = arith.constant 0 : i32
    %c0_i32_0 = arith.constant 0 : i32
    %c0_i32_1 = arith.constant 0 : i32
    %c0_i32_2 = arith.constant 0 : i32
    return %c0_i32, %c0_i32_0, %c0_i32_1 : i32, i32, i32
  }
  func.func @transform_5(%arg0: i32) -> (i32, i32) {
    %c0_i32 = arith.constant 0 : i32
    %c0_i32_0 = arith.constant 0 : i32
    %c0_i32_1 = arith.constant 0 : i32
    return %c0_i32, %c0_i32_0 : i32, i32
  }
  func.func @transform_6(%arg0: i32) -> (i32, i32) {
    %c0_i32 = arith.constant 0 : i32
    %c0_i32_0 = arith.constant 0 : i32
    %c0_i32_1 = arith.constant 0 : i32
    return %c0_i32, %c0_i32_0 : i32, i32
  }
  func.func @transform_7(%arg0: i32) -> (i32, i32) {
    %c0_i32 = arith.constant 0 : i32
    %c0_i32_0 = arith.constant 0 : i32
    return %c0_i32, %arg0 : i32, i32
  }
}

</mosaic_0001>

<bundles_post_ra>
// kernel: _nnmf_forward_jit.1
= control target key start
LH: loop header
LB: loop body
LE: loop exit
PB: predicated region body
PF: predicated region fallthrough
CT: control target
= control target key end

     0   :  { %v540_v1 = vmov 0   ;;  %s541_s9 = smov 112   ;;  %vm75_vm0 = vcmask 130048   ;;  %vm196_vm1 = vcmask 261120   ;;  %s725_s1 = inlined_call_operand.vmem [shape: bf16[2,32,32], index: 1, kind: input, shape index: {}]   ;;  %s726_s2 = inlined_call_operand.vmem [shape: f32[2,32,1], index: 2, kind: input, shape index: {}]   ;;  %s727_s0 = inlined_call_operand.vmem [shape: f32[112,128], index: 0, kind: input, shape index: {}]   ;;  %s728_s4 = inlined_call_operand.vmem [shape: f32[2,32,1], index: 4, kind: input, shape index: {}]   ;;  %s729_s6 = inlined_call_operand.vmem [shape: f32[2,1], index: 6, kind: input, shape index: {}]   ;;  %s730_s5 = inlined_call_operand.vmem [shape: bf16[2,32], index: 5, kind: input, shape index: {}]   ;;  %s731_s7 = inlined_call_operand.vmem [shape: f32[2,128], index: 7, kind: output, shape index: {}]   ;;  %s732_s3 = inlined_call_operand.vmem [shape: bf16[2,32,32], index: 3, kind: input, shape index: {}]  }
   0x1   :  { %v519_v0 = vld [vmem:[%s725_s1 + $0x8] sm:$0xff]  ;;  %529 = vset.pattern.permute.xlu1 %v540_v1  ;;  %v128_v2 = vld [vmem:[%s726_s2 + $0x10] sm:$0xff]  ;;  %530 = vset.pattern.permute.xlu2 %v540_v1  ;;  %v27_v3 = vld [vmem:[%s727_s0] sm:$0xff] }
   0x2   :  { %142 = vperm.xlu1 %529, %v128_v2   ;;  %v28_v4 = vld [vmem:[%s727_s0 + $0x8] sm:$0xff]  ;;  %531 = vset.pattern.permute.xlu0 %v540_v1  ;;  %v29_v6 = vld [vmem:[%s727_s0 + $0x10] sm:$0xff]  ;;  %v30_v7 = vld [vmem:[%s727_s0 + $0x18] sm:$0xff] }
   0x3   :  { %73 = vrot.lane.b32.xlu0 %v519_v0, %s541_s9  ;;  %v59_v5 = vpack.c.bf16 %v28_v4, %v27_v3  ;;  %v31_v8 = vld [vmem:[%s727_s0 + $0x20] sm:$0xff]  ;;  %v32_v9 = vld [vmem:[%s727_s0 + $0x28] sm:$0xff]  ;;  %v41_v10 = vmax.f32 %v29_v6, 0.0  ;;  %v33_v11 = vld [vmem:[%s727_s0 + $0x30] sm:$0xff]  ;;  %v42_v14 = vmax.f32 %v30_v7, 0.0 }
   0x4   :  { %v34_v12 = vld [vmem:[%s727_s0 + $0x38] sm:$0xff]  ;;  %v35_v13 = vld [vmem:[%s727_s0 + $0x40] sm:$0xff]  ;;  %v47_v15 = vmax.f32 %v31_v8, 0.0  ;;  %v48_v16 = vmax.f32 %v32_v9, 0.0  ;;  %v36_v18 = vld [vmem:[%s727_s0 + $0x48] sm:$0xff]  ;;  %v43_v19 = vmax.f32 %v33_v11, 0.0 }
   0x5   :  { %114 = vmatpush.bf16.msra.mxu1 %v59_v5  ;;  %v518_v17 = vld [vmem:[%s725_s1] sm:$0xff]  ;;  %v44_v20 = vmax.f32 %v34_v12, 0.0  ;;  %v49_v21 = vmax.f32 %v35_v13, 0.0  ;;  %v129_v23 = vld [vmem:[%s726_s2 + $0x18] sm:$0xff]  ;;  %v50_v24 = vmax.f32 %v36_v18, 0.0  ;;  %v473_v33 = vld [vmem:[%s726_s2 + $0x28] sm:$0xff] }
   0x6   :  { %v126_v22 = vld [vmem:[%s726_s2] sm:$0xff]  ;;  %v45_v25 = vmul.f32 %v43_v19, %v41_v10  ;;  %v475_v32 = vld [vmem:[%s726_s2 + $0x38] sm:$0xff]  ;;  %v127_v35 = vld [vmem:[%s726_s2 + $0x8] sm:$0xff] }
   0x7   :  { %132 = vperm.xlu2 %530, %v126_v22   ;;  %v46_v26 = vmul.f32 %v44_v20, %v42_v14  ;;  %v51_v27 = vmul.f32 %v49_v21, %v47_v15  ;;  %v52_v28 = vmul.f32 %v50_v24, %v48_v16  ;;  %v280_v34 = vld [vmem:[%s728_s4 + $0x18] sm:$0xff]  ;;  %v504_v36 = vld [vmem:[%s728_s4 + $0x30] sm:$0xff]  ;;  %v472_v37 = vld [vmem:[%s726_s2 + $0x20] sm:$0xff] }
   0x8   :  { %466 = vmatmul.msk.bf16.vlgmr.msra.gmra.mxu1 %vm75_vm0, %v518_v17  ;;  %v503_v38 = vld [vmem:[%s728_s4 + $0x28] sm:$0xff]  ;;  %v225_v39 = vld [vmem:[%s729_s6] sm:$0x1]  ;;  %v505_v41 = vld [vmem:[%s728_s4 + $0x38] sm:$0xff] }
   0x9   :  { %v53_v29 = vadd.f32 %v51_v27, %v45_v25  ;;  %v54_v30 = vadd.f32 %v52_v28, %v46_v26  ;;  %v277_v40 = vld [vmem:[%s728_s4] sm:$0xff]  ;;  %v474_v52 = vld [vmem:[%s726_s2 + $0x30] sm:$0xff]  ;;  %v278_v6 = vld [vmem:[%s728_s4 + $0x8] sm:$0xff] }
   0xa   :  { %147 = vperm.xlu1 %529, %v129_v23   ;;  %v405_v43 = vld [vmem:[%s729_s6 + $0x1] sm:$0x1]  ;;  %v520_v5 = vld [vmem:[%s725_s1 + $0x10] sm:$0xff]  ;;  %v521_v8 = vld [vmem:[%s725_s1 + $0x18] sm:$0xff] }
   0xb   :  { %71 = vrot.lane.b32.xlu0 %v518_v17, %s541_s9  ;;  %v60_v31 = vpack.c.bf16 %v54_v30, %v53_v29  ;;  %v502_v7 = vld [vmem:[%s728_s4 + $0x20] sm:$0xff] }
   0xc   :  { %v222_v10 = vld [vmem:[%s730_s5] sm:$0x1] }
   0xd   :  { %526 = vmatpush.bf16.msra.mxu2 %v60_v31  ;;  %89 = vmatpush.bf16.msra.mxu0 %v60_v31  ;;  %411 = vst [vmem:[#allocation1] ss:$9 sm:$0xff] %v222_v10 }
   0xf   :  { %137 = vperm.xlu2 %530, %v127_v35  }
  0x12   :  { %183 = vperm.xlu1 %529, %v475_v32  }
  0x13   :  { %178 = vperm.xlu0 %531, %v474_v52   ;;  %v522_v52 = vld [vmem:[%s732_s3] sm:$0xff] }
  0x17   :  { %168 = vperm.xlu2 %530, %v472_v37  }
  0x18   :  { %467 = vmatmul.msk.bf16.gmra.mxu1 %vm75_vm0, %v519_v0  ;;  %v279_v0 = vld [vmem:[%s728_s4 + $0x10] sm:$0xff] }
  0x1a   :  { %173 = vperm.xlu1 %529, %v473_v33  }
  0x1b   :  { %293 = vperm.xlu0 %531, %v279_v0  }
  0x1f   :  { %228 = vperm.xlu2 %530, %v225_v39  }
  0x22   :  { %298 = vperm.xlu1 %529, %v280_v34  }
  0x23   :  { %288 = vperm.xlu0 %531, %v278_v6  }
  0x27   :  { %283 = vperm.xlu2 %530, %v277_v40   ;;  %v39_v40 = vld [vmem:[%s727_s0 + $0x60] sm:$0xff] }
  0x2a   :  { %360 = vperm.xlu1 %529, %v504_v36  }
  0x2b   :  { %350 = vperm.xlu0 %531, %v502_v7  }
  0x2f   :  { %365 = vperm.xlu2 %530, %v505_v41   ;;  %v40_v41 = vld [vmem:[%s727_s0 + $0x68] sm:$0xff] }
  0x32   :  { %355 = vperm.xlu1 %529, %v503_v38  }
  0x37   :  { %408 = vperm.xlu2 %530, %v405_v43  }
  0x61   :  { %v133_v50 = vpop.permute.xlu2 %132 }
  0x69   :  { %v138_v63 = vpop.permute.xlu2 %137 }
  0x71   :  { %v169_v21 = vpop.permute.xlu2 %168 }
  0x74   :  { %v143_v48 = vpop.permute.xlu1 %142 }
  0x75   :  { %v74_v42 = vpop.permute.xlu0 %73 }
  0x76   :  { %465 = vmatmul.msk.bf16.vlgmr.msra.gmra.mxu2 %vm75_vm0, %v74_v42 }
  0x79   :  { %v229_v24 = vpop.permute.xlu2 %228 }
  0x7c   :  { %v148_v57 = vpop.permute.xlu1 %147 }
  0x7d   :  { %v72_v44 = vpop.permute.xlu0 %71 }
  0x7e   :  { %464 = vmatmul.msk.bf16.vlgmr.msra.gmra.mxu0 %vm75_vm0, %v72_v44  ;;  %v37_v44 = vld [vmem:[%s727_s0 + $0x50] sm:$0xff] }
  0x84   :  { %v184_v12 = vpop.permute.xlu1 %183 }
  0x85   :  { %v116_v45 = vpop.f32.mrf.mxu1  ;;  %v179_v14 = vpop.permute.xlu0 %178 }
  0x8c   :  { %v174_v18 = vpop.permute.xlu1 %173 }
  0x8d   :  { %v118_v46 = vpop.f32.mrf.mxu1 }
  0x95   :  { %v121_v47 = vpop.f32.mrf.mxu1 }
  0x9d   :  { %v123_v54 = vpop.f32.mrf.mxu1 }
  0xf9   :  { %v96_v49 = vpop.f32.mrf.mxu2 }
  0xfa   :  { %v122_v53 = vadd.f32 %v121_v47, %v96_v49 }
  0xfb   :  { %v91_v51 = vpop.f32.mrf.mxu0 }
  0xfc   :  { %v152_v59 = vadd.f32 %v143_v48, %v122_v53  ;;  %v117_v60 = vadd.f32 %v116_v45, %v91_v51  ;;  %v38_v45 = vld [vmem:[%s727_s0 + $0x58] sm:$0xff]  ;;  %v523_v53 = vld [vmem:[%s732_s3 + $0x8] sm:$0xff] }
  0xfe   :  { %v150_v3 = vadd.f32 %v133_v50, %v117_v60 }
 0x101   :  { %v98_v55 = vpop.f32.mrf.mxu2 }
 0x102   :  { %v124_v56 = vadd.f32 %v123_v54, %v98_v55 }
 0x103   :  { %v93_v58 = vpop.f32.mrf.mxu0 }
 0x104   :  { %v153_v61 = vadd.f32 %v148_v57, %v124_v56  ;;  %v119_v62 = vadd.f32 %v118_v46, %v93_v58  ;;  %v294_v56 = vpop.permute.xlu0 %293  ;;  %v299_v58 = vpop.permute.xlu1 %298 }
 0x106   :  { %v151_v1 = vadd.f32 %v138_v63, %v119_v62  ;;  %v160_v2 = vpack.c.bf16 %v153_v61, %v152_v59 }
 0x108   :  { %209 = vmatpush.bf16.msrb.mxu2 %v160_v2  ;;  %v159_v4 = vpack.c.bf16 %v151_v1, %v150_v3  ;;  %v284_v1 = vpop.permute.xlu2 %283 }
 0x10c   :  { %210 = vmatpush.bf16.msrb.mxu2 %v159_v4  ;;  %v289_v62 = vpop.permute.xlu0 %288  ;;  %v524_v4 = vld [vmem:[%s732_s3 + $0x10] sm:$0xff] }
 0x10f   :  { %484 = vmatmul.msk.bf16.vlgmr.msrb.gmra.mxu2 %vm196_vm1, %v520_v5  ;;  %v525_v5 = vld [vmem:[%s732_s3 + $0x18] sm:$0xff] }
 0x11f   :  { %485 = vmatmul.msk.bf16.gmra.mxu2 %vm196_vm1, %v521_v8  ;;  %v361_v8 = vpop.permute.xlu1 %360 }
 0x192   :  { %v212_v9 = vpop.f32.mrf.mxu2 }
 0x193   :  { %v213_v22 = vadd.f32 %v212_v9, %v169_v21 }
 0x19a   :  { %v214_v11 = vpop.f32.mrf.mxu2 }
 0x19b   :  { %v215_v19 = vadd.f32 %v214_v11, %v174_v18 }
 0x19d   :  { %v223_v23 = vpack.c.bf16 %v215_v19, %v213_v22  ;;  %v412_v19 = vld [vmem:[#allocation1] sm:$0xff] }
 0x19e   :  { %v413_v21 = vshrl.u32 %v412_v19, 16 }
 0x1a2   :  { %v217_v13 = vpop.f32.mrf.mxu2 }
 0x1a3   :  { %v218_v16 = vadd.f32 %v217_v13, %v179_v14  ;;  %v356_v14 = vpop.permute.xlu1 %355 }
 0x1aa   :  { %v219_v15 = vpop.f32.mrf.mxu2 }
 0x1ab   :  { %v220_v17 = vadd.f32 %v219_v15, %v184_v12 }
 0x1ad   :  { %v224_v20 = vpack.c.bf16 %v220_v17, %v218_v16  ;;  %v351_v17 = vpop.permute.xlu0 %350 }
 0x1af   :  { %240 = vmatpush.bf16.msra.mxu3 %v224_v20 }
 0x1b3   :  { %241 = vmatpush.bf16.msra.mxu3 %v223_v23 }
 0x1b6   :  { %486 = vmatmul.msk.bf16.vlgmr.msra.gmra.mxu3 %vm196_vm1, %v222_v10  ;;  %v366_v10 = vpop.permute.xlu2 %365 }
 0x1be   :  { %v409_v22 = vpop.permute.xlu2 %408 }
 0x239   :  { %v243_v25 = vpop.f32.mrf.mxu3 }
 0x23a   :  { %v244_v26 = vadd.f32 %v243_v25, %v229_v24 }
 0x23c   :  { %v487_v27 = vmul.f32 -1.442695, %v244_v26 }
 0x23e   :  { %532 = vpow2.f32 %v487_v27 }
 0x241   :  { %v245_v28 = vpop.f32.mrf.mxu3 }
 0x244   :  { %v533_v29 = vpop.eup %532 }
 0x245   :  { %v250_v30 = vadd.f32 1.0, %v533_v29 }
 0x247   :  { %534 = vrcp.f32 %v250_v30  ;;  %v262_v34 = vand.u32 2147483648, %v250_v30  ;;  %v260_v36 = vand.u32 2147483647, %v250_v30  ;;  %vm256_vm3 = vweird.f32 %v250_v30 }
 0x249   :  { %v263_v38 = vor.u32 1.1754944e-38, %v262_v34  ;;  %vm261_vm5 = vcmp.eq.f32.partialorder %v260_v36, 8.507059e+37 }
 0x24d   :  { %v535_v31 = vpop.eup %534 }
 0x24e   :  { %v252_v32 = vmul.f32 %v535_v31, %v250_v30  ;;  %vm257_vm2 = vweird.f32 %v535_v31 }
 0x24f   :  { %vm258_vm4 = vmor %vm256_vm3, %vm257_vm2 }
 0x250   :  { %v253_v33 = vsub.f32 1.0, %v252_v32 }
 0x252   :  { %v254_v35 = vmul.f32 %v535_v31, %v253_v33 }
 0x254   :  { %v255_v37 = vadd.f32 %v535_v31, %v254_v35 }
 0x256   :  { %v259_v39 = vsel %vm258_vm4, %v535_v31, %v255_v37 }
 0x257   :  { %v264_v42 = vsel %vm261_vm5, %v263_v38, %v259_v39 }
 0x258   :  { %v266_v43 = vperm.slane %v264_v42, 0  ;;  %450 = vst [vmem:[%s731_s7] sm:$0x1] %v264_v42 }
 0x25a   :  { %v269_v46 = vsub.f32 %v39_v40, %v266_v43  ;;  %v270_v47 = vsub.f32 %v40_v41, %v266_v43  ;;  %v267_v49 = vsub.f32 %v37_v44, %v266_v43  ;;  %v268_v50 = vsub.f32 %v38_v45, %v266_v43 }
 0x25c   :  { %v276_v48 = vpack.c.bf16 %v270_v47, %v269_v46  ;;  %v275_v51 = vpack.c.bf16 %v268_v50, %v267_v49 }
 0x25e   :  { %323 = vmatpush.bf16.msrb.mxu3 %v276_v48 }
 0x262   :  { %324 = vmatpush.bf16.msrb.mxu3 %v275_v51 }
 0x265   :  { %496 = vmatmul.msk.bf16.vlgmr.msrb.gmra.mxu3 %vm196_vm1, %v522_v52 }
 0x275   :  { %497 = vmatmul.msk.bf16.gmra.mxu3 %vm196_vm1, %v523_v53 }
 0x2e8   :  { %v326_v54 = vpop.f32.mrf.mxu3 }
 0x2e9   :  { %v327_v2 = vadd.f32 %v326_v54, %v284_v1 }
 0x2f0   :  { %v328_v55 = vpop.f32.mrf.mxu3 }
 0x2f1   :  { %v329_v63 = vadd.f32 %v328_v55, %v289_v62 }
 0x2f3   :  { %v341_v3 = vpack.c.bf16 %v329_v63, %v327_v2 }
 0x2f8   :  { %v331_v57 = vpop.f32.mrf.mxu3 }
 0x2f9   :  { %v332_v60 = vadd.f32 %v331_v57, %v294_v56 }
 0x300   :  { %v333_v59 = vpop.f32.mrf.mxu3 }
 0x301   :  { %v334_v61 = vadd.f32 %v333_v59, %v299_v58 }
 0x303   :  { %v342_v0 = vpack.c.bf16 %v334_v61, %v332_v60 }
 0x305   :  { %390 = vmatpush.bf16.msrb.mxu0 %v342_v0 }
 0x309   :  { %391 = vmatpush.bf16.msrb.mxu0 %v341_v3 }
 0x30c   :  { %514 = vmatmul.msk.bf16.vlgmr.msrb.gmra.mxu0 %vm196_vm1, %v524_v4 }
 0x31c   :  { %515 = vmatmul.msk.bf16.gmra.mxu0 %vm196_vm1, %v525_v5 }
 0x389   :  { %v393_v6 = vpop.f32.mrf.mxu0 }
 0x38a   :  { %v394_v18 = vadd.f32 %v393_v6, %v351_v17 }
 0x391   :  { %v395_v7 = vpop.f32.mrf.mxu0 }
 0x392   :  { %v396_v15 = vadd.f32 %v395_v7, %v356_v14 }
 0x394   :  { %v403_v20 = vpack.c.bf16 %v396_v15, %v394_v18 }
 0x399   :  { %v398_v9 = vpop.f32.mrf.mxu0 }
 0x39a   :  { %v399_v12 = vadd.f32 %v398_v9, %v361_v8 }
 0x3a1   :  { %v400_v11 = vpop.f32.mrf.mxu0 }
 0x3a2   :  { %v401_v13 = vadd.f32 %v400_v11, %v366_v10 }
 0x3a4   :  { %v404_v16 = vpack.c.bf16 %v401_v13, %v399_v12 }
 0x3a6   :  { %424 = vmatpush.bf16.msrb.mxu1 %v404_v16 }
 0x3aa   :  { %425 = vmatpush.bf16.msrb.mxu1 %v403_v20 }
 0x3ad   :  { %516 = vmatmul.msk.bf16.vlgmr.msrb.gmra.mxu1 %vm196_vm1, %v413_v21 }
 0x42a   :  { %v427_v23 = vpop.f32.mrf.mxu1 }
 0x42b   :  { %v428_v24 = vadd.f32 %v427_v23, %v409_v22 }
 0x42d   :  { %v517_v25 = vmul.f32 -1.442695, %v428_v24 }
 0x42f   :  { %536 = vpow2.f32 %v517_v25 }
 0x432   :  { %v429_v26 = vpop.f32.mrf.mxu1 }
 0x435   :  { %v537_v27 = vpop.eup %536 }
 0x436   :  { %v434_v28 = vadd.f32 1.0, %v537_v27 }
 0x438   :  { %538 = vrcp.f32 %v434_v28  ;;  %v446_v32 = vand.u32 2147483648, %v434_v28  ;;  %v444_v34 = vand.u32 2147483647, %v434_v28  ;;  %vm440_vm7 = vweird.f32 %v434_v28 }
 0x43a   :  { %v447_v36 = vor.u32 1.1754944e-38, %v446_v32  ;;  %vm445_vm9 = vcmp.eq.f32.partialorder %v444_v34, 8.507059e+37 }
 0x43e   :  { %v539_v29 = vpop.eup %538 }
 0x43f   :  { %v436_v30 = vmul.f32 %v539_v29, %v434_v28  ;;  %vm441_vm6 = vweird.f32 %v539_v29 }
 0x440   :  { %vm442_vm8 = vmor %vm440_vm7, %vm441_vm6 }
 0x441   :  { %v437_v31 = vsub.f32 1.0, %v436_v30 }
 0x443   :  { %v438_v33 = vmul.f32 %v539_v29, %v437_v31 }
 0x445   :  { %v439_v35 = vadd.f32 %v539_v29, %v438_v33 }
 0x447   :  { %v443_v37 = vsel %vm442_vm8, %v539_v29, %v439_v35 }
 0x448   :  { %v448_v38 = vsel %vm445_vm9, %v447_v36, %v443_v37 }
 0x449   :  { %451 = vst [vmem:[%s731_s7 + $0x1] sm:$0x1] %v448_v38 }

</bundles_post_ra>
